<compile_context>
chip_gen: v7x
topology: tpu7x:2x2x1
jax: 0.10.0
libtpu: 0.0.40
codegen_flags: <defaults>
</compile_context>

<pallas_src>
import jax
import jax.numpy as jnp
from jax.experimental import pallas as pl
from jax.experimental.pallas import tpu as pltpu

EPS = 1e-5


# ---------------------------------------------------------------------------
# Kernels
# ---------------------------------------------------------------------------
def _conv1_kernel(xpad_ref, t_ref, c1pad_ref, st_ref):
    """conv1 over one full image + per-image bn1 partial stats.

    xpad_ref  : (1, H+2, W*C)   bf16  H-zero-padded input image (lane-dense)
    t_ref     : (3*W*C, W*C)    bf16  stacked block-Toeplitz conv1 weights
    c1pad_ref : (1, H+2, W*C)   bf16  H-padded raw conv1 output (pad rows zeroed)
    st_ref    : (1, 2, W*C)     f32   per-image [sum, sum-of-squares]
    """
    h = c1pad_ref.shape[1] - 2
    wc = c1pad_ref.shape[2]

    # K = 3*W*C fused tap matmul: LHS lanes = [rows ky..ky+H-1 | ky = 0,1,2].
    lhs = jnp.concatenate([xpad_ref[0, ky:ky + h, :] for ky in range(3)],
                          axis=-1)                                  # (H, 3*WC)
    acc = jnp.dot(lhs, t_ref[...], preferred_element_type=jnp.float32)

    # Write straight into the H-padded buffer conv2 will consume (no wrapper
    # re-pad / halo duplication of the intermediate).
    zero_row = jnp.zeros((1, wc), c1pad_ref.dtype)
    c1pad_ref[0, 0:1, :] = zero_row
    c1pad_ref[0, h + 1:h + 2, :] = zero_row
    c1pad_ref[0, 1:h + 1, :] = acc.astype(c1pad_ref.dtype)          # bf16 store

    # BN statistics from the f32 accumulator (not the rounded bf16 store),
    # emitted as a single stacked (2, WC) store.
    st_ref[0] = jnp.concatenate(
        [jnp.sum(acc, axis=0, keepdims=True),
         jnp.sum(acc * acc, axis=0, keepdims=True)], axis=0)


def _conv2_kernel(c1pad_ref, s_ref, b_ref, t_ref, c2_ref, st_ref):
    """bn1 affine + relu + conv2 over one full image + per-image bn2 stats.

    c1pad_ref : (1, H+2, W*C)  bf16  H-padded raw conv1 image
    s_ref     : (1, W*C)       f32   folded bn1 scale (lane-broadcast over W)
    b_ref     : (1, W*C)       f32   folded bn1 shift
    t_ref     : (3*W*C, W*C)   bf16  stacked block-Toeplitz conv2 weights
    c2_ref    : (1, H, W*C)    bf16  raw conv2 output
    st_ref    : (1, 2, W*C)    f32   per-image [sum, sum-of-squares]
    """
    h = c2_ref.shape[1]

    # BN affine + ReLU in f32 (keep elementwise math off bf16 on v5e's VPU).
    y = c1pad_ref[0].astype(jnp.float32) * s_ref[...] + b_ref[...]
    y = jnp.maximum(y, 0.0)
    # The halo rows are conv2's spatial zero padding: force them back to zero
    # *after* the affine+relu (affine of 0 is not 0).
    row = jax.lax.broadcasted_iota(jnp.int32, (h + 2, 1), 0)
    y = jnp.where((row >= 1) & (row <= h), y, 0.0).astype(jnp.bfloat16)

    lhs = jnp.concatenate([y[ky:ky + h, :] for ky in range(3)], axis=-1)
    acc = jnp.dot(lhs, t_ref[...], preferred_element_type=jnp.float32)

    c2_ref[0] = acc.astype(c2_ref.dtype)                            # bf16 store
    st_ref[0] = jnp.concatenate(
        [jnp.sum(acc, axis=0, keepdims=True),
         jnp.sum(acc * acc, axis=0, keepdims=True)], axis=0)


# ---------------------------------------------------------------------------
# Wrapper-side helpers (layout glue, weight preparation, BN finalize)
# ---------------------------------------------------------------------------
def _toeplitz_weights(wgt, width, chans, dtype):
    """PyTorch (Cout, Cin, 3, 3) conv weight -> (3*W*C, W*C) stacked Toeplitz.

    T[ky*W*C + u*C + ci, x*C + co] = w[co, ci, ky, u - x + 1] when
    0 <= u-x+1 <= 2, else 0: the kx taps and the zero padding along W are baked
    into a dense matrix per ky tap; stacking the taps along K turns each 3x3
    conv into a single (H, 3*W*C) @ (3*W*C, W*C) MXU matmul.
    # TODO(synk): at DeepLab-scale W*C this dense banded matrix wastes MXU
    # throughput ~W/3x and VMEM ~(W*C)^2 -- block it over ~128-256 lane column
    # groups (or switch to a K=3C shifted-slice matmul) before scaling up.
    """
    w_perm = jnp.transpose(wgt, (2, 3, 1, 0)).astype(jnp.float32)  # (ky,kx,Ci,Co)
    u = jnp.arange(width)[:, None]                  # input (unpadded) column
    x = jnp.arange(width)[None, :]                  # output column
    kx = u - x + 1                                  # (W, W) tap index
    sel = ((kx >= 0) & (kx <= 2)).astype(jnp.float32)
    t = w_perm[:, jnp.clip(kx, 0, 2)]               # (3, W, W, Ci, Co)
    t = t * sel[None, :, :, None, None]
    t = jnp.transpose(t, (0, 1, 3, 2, 4))           # (3, u, Ci, x, Co)
    return t.reshape(3 * width * chans, width * chans).astype(dtype)


def _finalize_bn(partial_stats, gamma, beta, count, width, chans):
    """Reduce per-image [sum, sumsq] -> folded BN scale/shift, lane-broadcast."""
    s = jnp.sum(partial_stats, axis=0)                    # (2, W*C)
    s = s.reshape(2, width, chans).sum(axis=1)            # (2, C)
    mean = s[0] / count
    var = jnp.maximum(s[1] / count - mean * mean, 0.0)    # biased (training) var
    scale = gamma.astype(jnp.float32) * jax.lax.rsqrt(var + EPS)
    shift = beta.astype(jnp.float32) - mean * scale
    return (jnp.tile(scale, width).reshape(1, width * chans),
            jnp.tile(shift, width).reshape(1, width * chans))


# ---------------------------------------------------------------------------
# Main entry point
# ---------------------------------------------------------------------------
@jax.jit
def basic_block_pallas(x_nchw, w1, g1, b1, w2, g2, b2):
    """x_nchw: (N, C, H, W) f32; conv weights in PyTorch (O, I, 3, 3) layout."""
    n, c, h, w = x_nchw.shape
    wc = w * c
    assert wc % 128 == 0, "W*C must be a multiple of 128 for lane-dense stores"
    grid = (n,)   # one full image per step (for larger H, re-tile rows)

    # ---- layout glue: NCHW -> lane-dense (N, H, W*C); pad H; bf16 MXU inputs
    x_flat = jnp.transpose(x_nchw, (0, 2, 3, 1)).astype(jnp.float32)
    x_flat = x_flat.reshape(n, h, wc)
    x_pad = jnp.pad(x_flat, ((0, 0), (1, 1), (0, 0))).astype(jnp.bfloat16)
    t1 = _toeplitz_weights(w1, w, c, jnp.bfloat16)
    t2 = _toeplitz_weights(w2, w, c, jnp.bfloat16)

    # ---- shared specs: every block is lane-dense (last dim = W*C)
    pad_spec = pl.BlockSpec((1, h + 2, wc), lambda i: (i, 0, 0))
    row_spec = pl.BlockSpec((1, h, wc), lambda i: (i, 0, 0))
    stat_spec = pl.BlockSpec((1, 2, wc), lambda i: (i, 0, 0))
    # Resident blocks (constant index_map): fetched once across the grid.
    # TODO(synk): pipeline_mode=pl.Buffered(1) would drop the second buffered
    # copy of the Toeplitz weights -- only matters at DeepLab-scale W*C on v7x.
    wgt_spec = pl.BlockSpec((3 * wc, wc), lambda i: (0, 0))
    vec_spec = pl.BlockSpec((1, wc), lambda i: (0, 0))

    # TODO(synk): on v7x, pltpu.CORE_PARALLEL on the batch axis would split the
    # grid across the 2 TensorCores; "parallel" is the portable v5e/v6e choice.
    # vmem_limit should be re-derived per generation if tiles are scaled up
    # (<=48-56 MiB on v7x's 64 MiB VMEM); 32 MiB is ample at this shape.
    cparams = pltpu.CompilerParams(
        dimension_semantics=("parallel",),
        vmem_limit_bytes=32 * 1024 * 1024)

    conv_flops = 2 * n * h * (3 * wc) * wc
    cost1 = pl.CostEstimate(
        flops=conv_flops, transcendentals=0,
        bytes_accessed=(n * (h + 2) * wc * 2 + t1.size * 2
                        + n * (h + 2) * wc * 2 + n * 2 * wc * 4))
    cost2 = pl.CostEstimate(
        flops=conv_flops + 6 * n * (h + 2) * wc, transcendentals=0,
        bytes_accessed=(n * (h + 2) * wc * 2 + 2 * wc * 4 + t2.size * 2
                        + n * h * wc * 2 + n * 2 * wc * 4))
    cnt = float(n * h * w)

    # ---- call 1: conv1 + per-image bn1 partial stats -------------------------
    c1_pad, st1 = pl.pallas_call(
        _conv1_kernel,
        out_shape=(jax.ShapeDtypeStruct((n, h + 2, wc), jnp.bfloat16),
                   jax.ShapeDtypeStruct((n, 2, wc), jnp.float32)),
        grid_spec=pltpu.PrefetchScalarGridSpec(
            num_scalar_prefetch=0, grid=grid,
            in_specs=[pad_spec, wgt_spec],
            out_specs=[pad_spec, stat_spec]),
        compiler_params=cparams,
        cost_estimate=cost1,
    )(x_pad, t1)
    s1f, b1f = _finalize_bn(st1, g1, b1, cnt, w, c)

    # ---- call 2: bn1 + relu + conv2 + per-image bn2 partial stats ------------
    c2, st2 = pl.pallas_call(
        _conv2_kernel,
        out_shape=(jax.ShapeDtypeStruct((n, h, wc), jnp.bfloat16),
                   jax.ShapeDtypeStruct((n, 2, wc), jnp.float32)),
        grid_spec=pltpu.PrefetchScalarGridSpec(
            num_scalar_prefetch=0, grid=grid,
            in_specs=[pad_spec, vec_spec, vec_spec, wgt_spec],
            out_specs=[row_spec, stat_spec]),
        compiler_params=cparams,
        cost_estimate=cost2,
    )(c1_pad, s1f, b1f, t2)
    s2f, b2f = _finalize_bn(st2, g2, b2, cnt, w, c)

    # ---- epilogue: bn2 affine + residual + relu (plain jnp per perf review;
    # elementwise & memory bound, XLA fuses it with the output transpose).
    out_flat = jnp.maximum(c2.astype(jnp.float32) * s2f + b2f + x_flat, 0.0)
    out = out_flat.reshape(n, h, w, c)
    return jnp.transpose(out, (0, 3, 1, 2))   # back to NCHW


# ---------------------------------------------------------------------------
# Pure-JAX reference (PyTorch training-mode BasicBlock.forward)
# ---------------------------------------------------------------------------
def basic_block_ref(x_nchw, w1, g1, b1, w2, g2, b2,
                    mxu_dtype=None, store_dtype=None):
    """mxu_dtype: quantize conv inputs/weights (mirrors the kernel's bf16 MXU
    feed).  store_dtype: round conv outputs before the BN affine (mirrors the
    kernel's bf16 intermediate storage); BN statistics always come from the
    unrounded f32 conv output, exactly like the kernel."""
    x = jnp.transpose(x_nchw, (0, 2, 3, 1)).astype(jnp.float32)

    def q(a, dt):
        return a.astype(dt).astype(jnp.float32) if dt is not None else a

    def conv(y, wgt):
        w_hwio = jnp.transpose(wgt, (2, 3, 1, 0)).astype(jnp.float32)
        return jax.lax.conv_general_dilated(
            q(y, mxu_dtype), q(w_hwio, mxu_dtype), window_strides=(1, 1),
            padding=((1, 1), (1, 1)),
            dimension_numbers=("NHWC", "HWIO", "NHWC"),
            precision=jax.lax.Precision.HIGHEST)

    def bn(y_f32, g, b):
        mean = jnp.mean(y_f32, axis=(0, 1, 2), keepdims=True)
        var = jnp.mean((y_f32 - mean) ** 2, axis=(0, 1, 2), keepdims=True)
        y = q(y_f32, store_dtype)
        return (y - mean) * jax.lax.rsqrt(var + EPS) * g + b

    out = jnp.maximum(bn(conv(x, w1), g1, b1), 0.0)
    out = bn(conv(out, w2), g2, b2) + x
    return jnp.transpose(jnp.maximum(out, 0.0), (0, 3, 1, 2))


if __name__ == "__main__":
    # Small shapes consistent with the module (stride=1, downsample=None =>
    # Cin == Cout).  W * C = 128 so activations exactly fill the 128-lane axis.
    N, C, H, W = 2, 8, 16, 16

    key = jax.random.PRNGKey(0)
    kx, kw1, kw2, kg1, kb1, kg2, kb2 = jax.random.split(key, 7)
    x = jax.random.normal(kx, (N, C, H, W), jnp.float32)
    w1 = 0.1 * jax.random.normal(kw1, (C, C, 3, 3), jnp.float32)   # conv1 (O,I,3,3)
    w2 = 0.1 * jax.random.normal(kw2, (C, C, 3, 3), jnp.float32)   # conv2 (O,I,3,3)
    g1 = 1.0 + 0.1 * jax.random.normal(kg1, (C,), jnp.float32)     # bn1 gamma
    b1 = 0.1 * jax.random.normal(kb1, (C,), jnp.float32)           # bn1 beta
    g2 = 1.0 + 0.1 * jax.random.normal(kg2, (C,), jnp.float32)     # bn2 gamma
    b2 = 0.1 * jax.random.normal(kb2, (C,), jnp.float32)           # bn2 beta

    out = jax.block_until_ready(basic_block_pallas(x, w1, g1, b1, w2, g2, b2))
    assert out.shape == (N, C, H, W), out.shape

    # Tight check: reference mirrors the kernel numerics (bf16 MXU inputs, bf16
    # intermediate storage, BN stats from the f32 accumulator).
    ref_q = basic_block_ref(x, w1, g1, b1, w2, g2, b2,
                            mxu_dtype=jnp.bfloat16, store_dtype=jnp.bfloat16)
    err_q = float(jnp.max(jnp.abs(out - ref_q)))
    assert jnp.allclose(out, ref_q, atol=3e-3, rtol=3e-3), err_q

    # Loose check vs the pure-f32 reference (difference = bf16 MXU inputs plus
    # bf16 storage of the two conv intermediates).
    ref = basic_block_ref(x, w1, g1, b1, w2, g2, b2)
    err = float(jnp.max(jnp.abs(out - ref)))
    assert jnp.allclose(out, ref, atol=1e-1, rtol=1e-1), err

    print("KERNEL_OK")
</pallas_src>

<mosaic_0001>
module attributes {stable_mosaic.version = 11 : i64} {
  func.func @_conv1_kernel(%arg0: i32, %arg1: memref<1x18x128xbf16, #tpu.memory_space<vmem>>, %arg2: memref<384x128xbf16, #tpu.memory_space<vmem>>, %arg3: memref<1x18x128xbf16, #tpu.memory_space<vmem>>, %arg4: memref<1x2x128xf32, #tpu.memory_space<vmem>>) attributes {dimension_semantics = [#tpu.dimension_semantics<parallel>], iteration_bounds = array<i64: 2>, scalar_prefetch = 0 : i64, scratch_operands = 0 : i64, tpu.core_type = #tpu.core_type<tc>, window_params = [{transform_indices = @transform_0, window_bounds = array<i64: 1, 18, 128>}, {pipeline_mode = #tpu.pipeline_mode<synchronous>, transform_indices = @transform_1, window_bounds = array<i64: 384, 128>}, {transform_indices = @transform_2, window_bounds = array<i64: 1, 18, 128>}, {transform_indices = @transform_3, window_bounds = array<i64: 1, 2, 128>}]} {
    %c0 = arith.constant 0 : index
    %c0_0 = arith.constant 0 : index
    %c0_1 = arith.constant 0 : index
    %0 = vector.load %arg1[%c0, %c0_0, %c0_1] : memref<1x18x128xbf16, #tpu.memory_space<vmem>>, vector<1x16x128xbf16>
    %1 = vector.shape_cast %0 : vector<1x16x128xbf16> to vector<16x128xbf16>
    %c0_2 = arith.constant 0 : index
    %c1 = arith.constant 1 : index
    %c0_3 = arith.constant 0 : index
    %2 = vector.load %arg1[%c0_2, %c1, %c0_3] : memref<1x18x128xbf16, #tpu.memory_space<vmem>>, vector<1x16x128xbf16>
    %3 = vector.shape_cast %2 : vector<1x16x128xbf16> to vector<16x128xbf16>
    %c0_4 = arith.constant 0 : index
    %c2 = arith.constant 2 : index
    %c0_5 = arith.constant 0 : index
    %4 = vector.load %arg1[%c0_4, %c2, %c0_5] : memref<1x18x128xbf16, #tpu.memory_space<vmem>>, vector<1x16x128xbf16>
    %5 = vector.shape_cast %4 : vector<1x16x128xbf16> to vector<16x128xbf16>
    %6 = tpu.concatenate %1, %3, %5 in 1 : vector<16x128xbf16>, vector<16x128xbf16>, vector<16x128xbf16> -> vector<16x384xbf16>
    %c0_6 = arith.constant 0 : index
    %c0_7 = arith.constant 0 : index
    %7 = vector.load %arg2[%c0_6, %c0_7] : memref<384x128xbf16, #tpu.memory_space<vmem>>, vector<384x128xbf16>
    %cst = arith.constant dense<0.000000e+00> : vector<16x128xf32>
    %8 = tpu.matmul %6, %7, %cst {dimension_numbers = #tpu.dot_dimension_numbers<[1], [0], [0], [1], [0, 0, 1, 1], [], []>} : vector<16x384xbf16>, vector<384x128xbf16>, vector<16x128xf32> -> vector<16x128xf32>
    %cst_8 = arith.constant 0.000000e+00 : bf16
    %9 = vector.broadcast %cst_8 : bf16 to vector<1x128xbf16>
    %c0_9 = arith.constant 0 : index
    %c0_10 = arith.constant 0 : index
    %c0_11 = arith.constant 0 : index
    %10 = vector.load %arg3[%c0_9, %c0_10, %c0_11] : memref<1x18x128xbf16, #tpu.memory_space<vmem>>, vector<1x1x128xbf16>
    %11 = vector.shape_cast %10 : vector<1x1x128xbf16> to vector<1x128xbf16>
    %12 = vector.shape_cast %9 : vector<1x128xbf16> to vector<1x1x128xbf16>
    tpu.vector_store %arg3[%c0_9, %c0_10, %c0_11], %12 {strides = array<i32>} : memref<1x18x128xbf16, #tpu.memory_space<vmem>>, vector<1x1x128xbf16>,
    %c0_12 = arith.constant 0 : index
    %c17 = arith.constant 17 : index
    %c0_13 = arith.constant 0 : index
    %13 = vector.load %arg3[%c0_12, %c17, %c0_13] : memref<1x18x128xbf16, #tpu.memory_space<vmem>>, vector<1x1x128xbf16>
    %14 = vector.shape_cast %13 : vector<1x1x128xbf16> to vector<1x128xbf16>
    %15 = vector.shape_cast %9 : vector<1x128xbf16> to vector<1x1x128xbf16>
    tpu.vector_store %arg3[%c0_12, %c17, %c0_13], %15 {strides = array<i32>} : memref<1x18x128xbf16, #tpu.memory_space<vmem>>, vector<1x1x128xbf16>,
    %16 = arith.truncf %8 : vector<16x128xf32> to vector<16x128xbf16>
    %c0_14 = arith.constant 0 : index
    %c1_15 = arith.constant 1 : index
    %c0_16 = arith.constant 0 : index
    %17 = vector.load %arg3[%c0_14, %c1_15, %c0_16] : memref<1x18x128xbf16, #tpu.memory_space<vmem>>, vector<1x16x128xbf16>
    %18 = vector.shape_cast %17 : vector<1x16x128xbf16> to vector<16x128xbf16>
    %19 = vector.shape_cast %16 : vector<16x128xbf16> to vector<1x16x128xbf16>
    tpu.vector_store %arg3[%c0_14, %c1_15, %c0_16], %19 {strides = array<i32>} : memref<1x18x128xbf16, #tpu.memory_space<vmem>>, vector<1x16x128xbf16>,
    %cst_17 = arith.constant dense<0.000000e+00> : vector<128xf32>
    %20 = vector.multi_reduction <add>, %8, %cst_17 [0] : vector<16x128xf32> to vector<128xf32>
    %21 = vector.shape_cast %20 : vector<128xf32> to vector<1x128xf32>
    %22 = arith.mulf %8, %8 : vector<16x128xf32>
    %cst_18 = arith.constant dense<0.000000e+00> : vector<128xf32>
    %23 = vector.multi_reduction <add>, %22, %cst_18 [0] : vector<16x128xf32> to vector<128xf32>
    %24 = vector.shape_cast %23 : vector<128xf32> to vector<1x128xf32>
    %25 = tpu.concatenate %21, %24 in 0 : vector<1x128xf32>, vector<1x128xf32> -> vector<2x128xf32>
    %c0_19 = arith.constant 0 : index
    %c0_20 = arith.constant 0 : index
    %c0_21 = arith.constant 0 : index
    %26 = vector.load %arg4[%c0_19, %c0_20, %c0_21] : memref<1x2x128xf32, #tpu.memory_space<vmem>>, vector<1x2x128xf32>
    %27 = vector.shape_cast %26 : vector<1x2x128xf32> to vector<2x128xf32>
    %28 = vector.shape_cast %25 : vector<2x128xf32> to vector<1x2x128xf32>
    tpu.vector_store %arg4[%c0_19, %c0_20, %c0_21], %28 {strides = array<i32>} : memref<1x2x128xf32, #tpu.memory_space<vmem>>, vector<1x2x128xf32>,
    return
  }
  func.func @transform_0(%arg0: i32) -> (i32, i32, i32) {
    %c0_i32 = arith.constant 0 : i32
    %c0_i32_0 = arith.constant 0 : i32
    %c0_i32_1 = arith.constant 0 : i32
    return %arg0, %c0_i32, %c0_i32_0 : i32, i32, i32
  }
  func.func @transform_1(%arg0: i32) -> (i32, i32) {
    %c0_i32 = arith.constant 0 : i32
    %c0_i32_0 = arith.constant 0 : i32
    %c0_i32_1 = arith.constant 0 : i32
    return %c0_i32, %c0_i32_0 : i32, i32
  }
  func.func @transform_2(%arg0: i32) -> (i32, i32, i32) {
    %c0_i32 = arith.constant 0 : i32
    %c0_i32_0 = arith.constant 0 : i32
    %c0_i32_1 = arith.constant 0 : i32
    return %arg0, %c0_i32, %c0_i32_0 : i32, i32, i32
  }
  func.func @transform_3(%arg0: i32) -> (i32, i32, i32) {
    %c0_i32 = arith.constant 0 : i32
    %c0_i32_0 = arith.constant 0 : i32
    %c0_i32_1 = arith.constant 0 : i32
    return %arg0, %c0_i32, %c0_i32_0 : i32, i32, i32
  }
}

module attributes {stable_mosaic.version = 11 : i64} {
  func.func @_conv2_kernel(%arg0: i32, %arg1: memref<1x18x128xbf16, #tpu.memory_space<vmem>>, %arg2: memref<1x128xf32, #tpu.memory_space<vmem>>, %arg3: memref<1x128xf32, #tpu.memory_space<vmem>>, %arg4: memref<384x128xbf16, #tpu.memory_space<vmem>>, %arg5: memref<1x16x128xbf16, #tpu.memory_space<vmem>>, %arg6: memref<1x2x128xf32, #tpu.memory_space<vmem>>) attributes {dimension_semantics = [#tpu.dimension_semantics<parallel>], iteration_bounds = array<i64: 2>, scalar_prefetch = 0 : i64, scratch_operands = 0 : i64, tpu.core_type = #tpu.core_type<tc>, window_params = [{transform_indices = @transform_0, window_bounds = array<i64: 1, 18, 128>}, {pipeline_mode = #tpu.pipeline_mode<synchronous>, transform_indices = @transform_1, window_bounds = array<i64: 1, 128>}, {pipeline_mode = #tpu.pipeline_mode<synchronous>, transform_indices = @transform_2, window_bounds = array<i64: 1, 128>}, {pipeline_mode = #tpu.pipeline_mode<synchronous>, transform_indices = @transform_3, window_bounds = array<i64: 384, 128>}, {transform_indices = @transform_4, window_bounds = array<i64: 1, 16, 128>}, {transform_indices = @transform_5, window_bounds = array<i64: 1, 2, 128>}]} {
    %c0 = arith.constant 0 : index
    %c0_0 = arith.constant 0 : index
    %c0_1 = arith.constant 0 : index
    %0 = vector.load %arg1[%c0, %c0_0, %c0_1] : memref<1x18x128xbf16, #tpu.memory_space<vmem>>, vector<1x18x128xbf16>
    %1 = vector.shape_cast %0 : vector<1x18x128xbf16> to vector<18x128xbf16>
    %2 = arith.extf %1 : vector<18x128xbf16> to vector<18x128xf32>
    %c0_2 = arith.constant 0 : index
    %c0_3 = arith.constant 0 : index
    %3 = vector.load %arg2[%c0_2, %c0_3] : memref<1x128xf32, #tpu.memory_space<vmem>>, vector<1x128xf32>
    %4 = vector.broadcast %3 : vector<1x128xf32> to vector<18x128xf32>
    %5 = arith.mulf %2, %4 : vector<18x128xf32>
    %c0_4 = arith.constant 0 : index
    %c0_5 = arith.constant 0 : index
    %6 = vector.load %arg3[%c0_4, %c0_5] : memref<1x128xf32, #tpu.memory_space<vmem>>, vector<1x128xf32>
    %7 = vector.broadcast %6 : vector<1x128xf32> to vector<18x128xf32>
    %8 = arith.addf %5, %7 : vector<18x128xf32>
    %cst = arith.constant 0.000000e+00 : f32
    %9 = vector.broadcast %cst : f32 to vector<18x128xf32>
    %10 = arith.maximumf %8, %9 : vector<18x128xf32>
    %11 = tpu.iota {dimensions = array<i32: 0>} : vector<18x1xi32>
    %c1_i32 = arith.constant 1 : i32
    %12 = vector.broadcast %c1_i32 : i32 to vector<18x1xi32>
    %13 = arith.cmpi sge, %11, %12 : vector<18x1xi32>
    %c16_i32 = arith.constant 16 : i32
    %14 = vector.broadcast %c16_i32 : i32 to vector<18x1xi32>
    %15 = arith.cmpi sle, %11, %14 : vector<18x1xi32>
    %16 = arith.andi %13, %15 : vector<18x1xi1>
    %cst_6 = arith.constant 0.000000e+00 : f32
    %17 = vector.shape_cast %16 : vector<18x1xi1> to vector<18x1xi1>
    %18 = vector.broadcast %17 : vector<18x1xi1> to vector<18x128xi1>
    %19 = vector.broadcast %cst_6 : f32 to vector<18x128xf32>
    %20 = arith.select %18, %10, %19 : vector<18x128xi1>, vector<18x128xf32>
    %21 = arith.truncf %20 : vector<18x128xf32> to vector<18x128xbf16>
    %22 = vector.extract_strided_slice %21 {offsets = [0, 0], sizes = [16, 128], strides = [1, 1]} : vector<18x128xbf16> to vector<16x128xbf16>
    %23 = vector.extract_strided_slice %21 {offsets = [1, 0], sizes = [16, 128], strides = [1, 1]} : vector<18x128xbf16> to vector<16x128xbf16>
    %24 = vector.extract_strided_slice %21 {offsets = [2, 0], sizes = [16, 128], strides = [1, 1]} : vector<18x128xbf16> to vector<16x128xbf16>
    %25 = tpu.concatenate %22, %23, %24 in 1 : vector<16x128xbf16>, vector<16x128xbf16>, vector<16x128xbf16> -> vector<16x384xbf16>
    %c0_7 = arith.constant 0 : index
    %c0_8 = arith.constant 0 : index
    %26 = vector.load %arg4[%c0_7, %c0_8] : memref<384x128xbf16, #tpu.memory_space<vmem>>, vector<384x128xbf16>
    %cst_9 = arith.constant dense<0.000000e+00> : vector<16x128xf32>
    %27 = tpu.matmul %25, %26, %cst_9 {dimension_numbers = #tpu.dot_dimension_numbers<[1], [0], [0], [1], [0, 0, 1, 1], [], []>} : vector<16x384xbf16>, vector<384x128xbf16>, vector<16x128xf32> -> vector<16x128xf32>
    %28 = arith.truncf %27 : vector<16x128xf32> to vector<16x128xbf16>
    %c0_10 = arith.constant 0 : index
    %c0_11 = arith.constant 0 : index
    %c0_12 = arith.constant 0 : index
    %29 = vector.load %arg5[%c0_10, %c0_11, %c0_12] : memref<1x16x128xbf16, #tpu.memory_space<vmem>>, vector<1x16x128xbf16>
    %30 = vector.shape_cast %29 : vector<1x16x128xbf16> to vector<16x128xbf16>
    %31 = vector.shape_cast %28 : vector<16x128xbf16> to vector<1x16x128xbf16>
    tpu.vector_store %arg5[%c0_10, %c0_11, %c0_12], %31 {strides = array<i32>} : memref<1x16x128xbf16, #tpu.memory_space<vmem>>, vector<1x16x128xbf16>,
    %cst_13 = arith.constant dense<0.000000e+00> : vector<128xf32>
    %32 = vector.multi_reduction <add>, %27, %cst_13 [0] : vector<16x128xf32> to vector<128xf32>
    %33 = vector.shape_cast %32 : vector<128xf32> to vector<1x128xf32>
    %34 = arith.mulf %27, %27 : vector<16x128xf32>
    %cst_14 = arith.constant dense<0.000000e+00> : vector<128xf32>
    %35 = vector.multi_reduction <add>, %34, %cst_14 [0] : vector<16x128xf32> to vector<128xf32>
    %36 = vector.shape_cast %35 : vector<128xf32> to vector<1x128xf32>
    %37 = tpu.concatenate %33, %36 in 0 : vector<1x128xf32>, vector<1x128xf32> -> vector<2x128xf32>
    %c0_15 = arith.constant 0 : index
    %c0_16 = arith.constant 0 : index
    %c0_17 = arith.constant 0 : index
    %38 = vector.load %arg6[%c0_15, %c0_16, %c0_17] : memref<1x2x128xf32, #tpu.memory_space<vmem>>, vector<1x2x128xf32>
    %39 = vector.shape_cast %38 : vector<1x2x128xf32> to vector<2x128xf32>
    %40 = vector.shape_cast %37 : vector<2x128xf32> to vector<1x2x128xf32>
    tpu.vector_store %arg6[%c0_15, %c0_16, %c0_17], %40 {strides = array<i32>} : memref<1x2x128xf32, #tpu.memory_space<vmem>>, vector<1x2x128xf32>,
    return
  }
  func.func @transform_0(%arg0: i32) -> (i32, i32, i32) {
    %c0_i32 = arith.constant 0 : i32
    %c0_i32_0 = arith.constant 0 : i32
    %c0_i32_1 = arith.constant 0 : i32
    return %arg0, %c0_i32, %c0_i32_0 : i32, i32, i32
  }
  func.func @transform_1(%arg0: i32) -> (i32, i32) {
    %c0_i32 = arith.constant 0 : i32
    %c0_i32_0 = arith.constant 0 : i32
    %c0_i32_1 = arith.constant 0 : i32
    return %c0_i32, %c0_i32_0 : i32, i32
  }
  func.func @transform_2(%arg0: i32) -> (i32, i32) {
    %c0_i32 = arith.constant 0 : i32
    %c0_i32_0 = arith.constant 0 : i32
    %c0_i32_1 = arith.constant 0 : i32
    return %c0_i32, %c0_i32_0 : i32, i32
  }
  func.func @transform_3(%arg0: i32) -> (i32, i32) {
    %c0_i32 = arith.constant 0 : i32
    %c0_i32_0 = arith.constant 0 : i32
    %c0_i32_1 = arith.constant 0 : i32
    return %c0_i32, %c0_i32_0 : i32, i32
  }
  func.func @transform_4(%arg0: i32) -> (i32, i32, i32) {
    %c0_i32 = arith.constant 0 : i32
    %c0_i32_0 = arith.constant 0 : i32
    %c0_i32_1 = arith.constant 0 : i32
    return %arg0, %c0_i32, %c0_i32_0 : i32, i32, i32
  }
  func.func @transform_5(%arg0: i32) -> (i32, i32, i32) {
    %c0_i32 = arith.constant 0 : i32
    %c0_i32_0 = arith.constant 0 : i32
    %c0_i32_1 = arith.constant 0 : i32
    return %arg0, %c0_i32, %c0_i32_0 : i32, i32, i32
  }
}

</mosaic_0001>

<bundles_post_ra>
// kernel: basic_block_pallas.2
= control target key start
LH: loop header
LB: loop body
LE: loop exit
PB: predicated region body
PF: predicated region fallthrough
CT: control target
= control target key end

     0   :  { %s805_s12 = smov 0   ;;  %s944_s0 = inlined_call_operand.vmem [shape: bf16[2,18,128], index: 0, kind: input, shape index: {}]   ;;  %s945_s1 = inlined_call_operand.vmem [shape: bf16[384,128], index: 1, kind: input, shape index: {}]   ;;  %s946_s2 = inlined_call_operand.vmem [shape: bf16[2,18,128], index: 2, kind: output, shape index: {0}]   ;;  %s947_s3 = inlined_call_operand.vmem [shape: f32[2,2,128], index: 3, kind: output, shape index: {1}]  }
   0x1 LB: > { %s645_s13 = sadd.s32 4294967295, %s781_s12   ;;  %p649_p0 = scmp.ge.s32.totalorder %s781_s12, 1  ;;  %s781_s12 = sphi %s805_s12, %s14_s12  }
   0x2   : > { %p140_p1 = scmp.lt.s32.totalorder %s781_s12, 3 }
   0x4   : > { %p141_p2 = pnand %p649_p0, %p140_p1 }
   0x5   : > { %v748_v0 = vld [vmem:[%s945_s1 + $0x40] sm:$0xff] (!%p141_p2)   ;;  %v783_v1 = vmov (!%p141_p2), 0.0   ;;  %v751_v4 = vld [vmem:[%s945_s1 + $0x48] sm:$0xff] (!%p141_p2)   ;;  %vm784_vm0 = vmmov (!%p141_p2), 0   ;;  %v754_v7 = vld [vmem:[%s945_s1 + $0x50] sm:$0xff] (!%p141_p2)   ;;  %p168_p3 = scmp.lt.s32.totalorder (!%p141_p2), %s645_s13, 1 }
   0x6   : > { %144 = sbr.rel (%p141_p2) target bundleno = 276 (0x114), region = 28  ;;  %717 = vmatprep.subr.bf16.mxu1 (!%p141_p2), %v783_v1  ;;  %v749_v2 = vld [vmem:[%s945_s1] sm:$0xff] (!%p141_p2)   ;;  %686 = vmatprep.subr.bf16.mxu0 (!%p141_p2), %v748_v0  ;;  %v752_v5 = vld [vmem:[%s945_s1 + $0x8] sm:$0xff] (!%p141_p2)   ;;  %v755_v8 = vld [vmem:[%s945_s1 + $0x10] sm:$0xff] (!%p141_p2)   ;;  %vm213_vm1 = vcmask (!%p141_p2), 1046528   ;;  %vm492_vm3 = vcmask (!%p141_p2), 1040384  }
   0x7   : > { %v750_v3 = vld [vmem:[%s945_s1 + $0x80] sm:$0xff] (!%p141_p2)   ;;  %687 = vmatpush3.bf16.msra.mxu0 (!%p141_p2), %v749_v2  ;;  %733 = vmatprep.mubr.msk.bf16.mxu1 (!%p141_p2), %vm784_vm0, %v783_v1  ;;  %v753_v6 = vld [vmem:[%s945_s1 + $0x88] sm:$0xff] (!%p141_p2)   ;;  %v756_v9 = vld [vmem:[%s945_s1 + $0x90] sm:$0xff] (!%p141_p2)   ;;  %vm196_vm2 = vsmask.f32 (!%p141_p2), 7424  ;;  %vm531_vm8 = vcmask (!%p141_p2), 1043456  }
   0x8   : > { %718 = vmatpush3.bf16.msra.mxu1 (!%p141_p2), %v750_v3  ;;  %688 = vmatprep.subr.bf16.mxu0 (!%p141_p2), %v751_v4  ;;  %v757_v10 = vld [vmem:[%s945_s1 + $0x58] sm:$0xff] (!%p141_p2)   ;;  %v760_v13 = vld [vmem:[%s945_s1 + $0x60] sm:$0xff] (!%p141_p2)   ;;  %v763_v16 = vld [vmem:[%s945_s1 + $0x68] sm:$0xff] (!%p141_p2)   ;;  %vm493_vm4 = vsmask.f32 (!%p141_p2), 256 }
   0x9   : > { %719 = vmatprep.subr.bf16.mxu1 (!%p141_p2), %v783_v1  ;;  %v758_v11 = vld [vmem:[%s945_s1 + $0x18] sm:$0xff] (!%p141_p2)   ;;  %v761_v14 = vld [vmem:[%s945_s1 + $0x20] sm:$0xff] (!%p141_p2)   ;;  %v764_v17 = vld [vmem:[%s945_s1 + $0x28] sm:$0xff] (!%p141_p2)   ;;  %vm498_vm6 = vsmask.f32 (!%p141_p2), 7938 }
   0xa   : > { %v759_v12 = vld [vmem:[%s945_s1 + $0x98] sm:$0xff] (!%p141_p2)   ;;  %v762_v15 = vld [vmem:[%s945_s1 + $0xa0] sm:$0xff] (!%p141_p2)   ;;  %v765_v18 = vld [vmem:[%s945_s1 + $0xa8] sm:$0xff] (!%p141_p2)   ;;  %vm509_vm9 = vsmask.f32 (!%p141_p2), 4368 }
   0xb   : > { %689 = vmatpush3.bf16.msra.mxu0 (!%p141_p2), %v752_v5  ;;  %v766_v19 = vld [vmem:[%s945_s1 + $0x70] sm:$0xff] (!%p141_p2)   ;;  %v769_v22 = vld [vmem:[%s945_s1 + $0x78] sm:$0xff] (!%p141_p2)   ;;  %vm915_vm5 = vmand (!%p141_p2), %vm492_vm3, %vm493_vm4 }
   0xc   : > { %720 = vmatpush3.bf16.msra.mxu1 (!%p141_p2), %v753_v6  ;;  %690 = vmatprep.subr.bf16.mxu0 (!%p141_p2), %v754_v7  ;;  %v767_v20 = vld [vmem:[%s945_s1 + $0x30] sm:$0xff] (!%p141_p2)   ;;  %v770_v28 = vld [vmem:[%s945_s1 + $0x38] sm:$0xff] (!%p141_p2)   ;;  %vm499_vm7 = vmand (!%p141_p2), %vm492_vm3, %vm498_vm6 }
   0xd   : > { %721 = vmatprep.subr.bf16.mxu1 %v783_v1  ;;  %s951_s13 = smov (!%p168_p3, %s645_s13), 1  ;;  %v768_v21 = vld [vmem:[%s945_s1 + $0xb0] sm:$0xff]   ;;  %v771_v33 = vld [vmem:[%s945_s1 + $0xb8] sm:$0xff]   ;;  %vm532_vm10 = vmand %vm531_vm8, %vm498_vm6 }
   0xe   : > { %s737_s21 = smul.u32 12, %s951_s13  ;;  %vm510_vm11 = vmor %vm493_vm4, %vm509_vm9  ;;  %s652_s19 = sshll.u32 %s951_s13, 1 }
   0xf   : > { %691 = vmatpush3.bf16.msra.mxu0 %v755_v8  ;;  %s181_s22 = scalar_lea.vmem %s947_s3, %s652_s19 }
  0x10   : > { %722 = vmatpush3.bf16.msra.mxu1 %v756_v9  ;;  %692 = vmatprep.subr.bf16.mxu0 %v757_v10  ;;  %s172_s5 = scalar_lea.vmem %s944_s0, %s737_s21  ;;  %s911_s18 = scalar_lea.vmem %s946_s2, %s737_s21 }
  0x11   : > { %723 = vmatprep.subr.bf16.mxu1 %v783_v1  ;;  %v183_v23 = vld [vmem:[%s172_s5] sm:$0xf]  ;;  %v184_v24 = vld [vmem:[%s172_s5 + $0x4] sm:$0xf]  ;;  %v500_v43 = vld [vmem:[%s911_s18 + $0x8] sm:$0x1] }
  0x12   : > { %v653_v25 = vcombine.low %v183_v23, %v184_v24  ;;  %v773_v26 = vld [vmem:[%s172_s5 + $0x8] ss:$0 sps:$4 sm:$0x11]   ;;  %v186_v27 = vld [vmem:[%s172_s5] sm:$0xe]  ;;  %v501_v45 = vsel %vm499_vm7, 0, %v500_v43 }
  0x13   : > { %693 = vmatpush3.bf16.msra.mxu0 %v758_v11  ;;  %v205_v31 = vshll.u32 %v773_v26, 16  ;;  %v655_v32 = vcombine.low %v186_v27, %v184_v24  ;;  %v215_v34 = vrot.slane %v773_v26, 1  ;;  %v495_v42 = vld [vmem:[%s911_s18] sm:$0x1]  ;;  %502 = vst [vmem:[%s911_s18 + $0x8] sm:$0x1] %v501_v45 }
  0x14   : > { %724 = vmatpush3.bf16.msra.mxu1 %v759_v12  ;;  %694 = vmatprep.subr.bf16.mxu0 %v760_v13  ;;  %v198_v29 = vshrl.u32 %v653_v25, 16  ;;  %v200_v30 = vshll.u32 %v653_v25, 16  ;;  %v496_v44 = vsel %vm915_vm5, 0, %v495_v42 }
  0x15   : > { %725 = vmatprep.subr.bf16.mxu1 %v783_v1  ;;  %v207_v36 = vrot.slane %v205_v31, 1  ;;  %v214_v37 = vrot.slane %v655_v32, 1  ;;  %497 = vst [vmem:[%s911_s18] sm:$0x1] %v496_v44 }
  0x16   : > { %v202_v35 = vrot.slane %v200_v30, 1 }
  0x17   : > { %695 = vmatpush3.bf16.msra.mxu0 %v761_v14  ;;  %v216_v39 = vsel %vm213_vm1, %v214_v37, %v215_v34 }
  0x18   : > { %726 = vmatpush3.bf16.msra.mxu1 %v762_v15  ;;  %696 = vmatprep.subr.bf16.mxu0 %v763_v16  ;;  %v203_v38 = vor.u32 %v202_v35, %v198_v29 }
  0x19   : > { %727 = vmatprep.subr.bf16.mxu1 %v783_v1 }
  0x1a   : > { %v208_v40 = vsel %vm196_vm2, %v203_v38, %v207_v36  ;;  %v537_v11 = vld [vmem:[%s911_s18 + $0x8] sm:$0x1] }
  0x1b   : > { %697 = vmatpush3.bf16.msra.mxu0 %v764_v17  ;;  %442 = vmatprep.mubr.bf16.mxu0 %v208_v40 }
  0x1c   : > { %728 = vmatpush3.bf16.msra.mxu1 %v765_v18  ;;  %698 = vmatprep.subr.bf16.mxu0 %v766_v19  ;;  %v533_v4 = vld [vmem:[%s911_s18] sm:$0xf] }
  0x1d   : > { %729 = vmatprep.subr.bf16.mxu1 %v783_v1 }
  0x1f   : > { %699 = vmatpush3.bf16.msra.mxu0 %v767_v20 }
  0x20   : > { %730 = vmatpush3.bf16.msra.mxu1 %v768_v21  ;;  %700 = vmatprep.subr.bf16.mxu0 %v769_v22 }
  0x21   : > { %731 = vmatprep.subr.bf16.mxu1 %v783_v1 }
  0x23   : > { %701 = vmatpush3.bf16.msra.mxu0 %v770_v28 }
  0x24   : > { %732 = vmatpush3.bf16.msra.mxu1 %v771_v33 }
  0x26   : > { %443 = vmatmul.mubr.bf16.vlgmr.msra.gmra.mrb[0].mxu0 %v653_v25 }
  0x27   : > { %734 = vmatmul.mubr.bf16.vlgmr.msra.gmra.mrb[0].mxu1 %v216_v39 }
  0xf9   : > { %v702_v46 = vpop.f32.mrb[0].mxu0 }
  0xfa   : > { %v485_v47 = vpop.f32.mrb[0].mxu1  ;;  %v703_v48 = vpop.f32.mrb[1].mxu0 }
  0xfb   : > { %v735_v49 = vpop.f32.mrb[1].mxu1  ;;  %v704_v50 = vadd.f32 %v703_v48, %v702_v46  ;;  %v705_v51 = vpop.f32.mrb[2].mxu0 }
  0xfc   : > { %v488_v52 = vpop.f32.mrb[2].mxu1  ;;  %v706_v53 = vpop.f32.mrb[3].mxu0 }
  0xfd   : > { %v736_v54 = vpop.f32.mrb[3].mxu1  ;;  %v486_v55 = vadd.f32 %v704_v50, %v485_v47  ;;  %v707_v56 = vadd.f32 %v706_v53, %v705_v51 }
  0xff   : > { %v684_v57 = vpack.c.bf16 %v486_v55, %v486_v55  ;;  %v489_v58 = vadd.f32 %v707_v56, %v488_v52  ;;  %v547_v62 = vmul.f32 %v486_v55, %v486_v55 }
 0x101   : > { %v512_v59 = vshrl.u32 %v684_v57, 16  ;;  %v685_v60 = vpack.c.bf16 %v489_v58, %v489_v58  ;;  %v540_v61 = vadd.f32 %v489_v58, %v486_v55  ;;  %v548_v63 = vmul.f32 %v489_v58, %v489_v58 }
 0x102   : > { %v515_v1 = vshll.u32 %v684_v57, 16 }
 0x103   : > { %v514_v0 = vrot.slane %v512_v59, 7  ;;  %v520_v2 = vshrl.u32 %v685_v60, 16  ;;  %v541_v3 = vrot.slane %v540_v61, 4  ;;  %v549_v5 = vadd.f32 %v548_v63, %v547_v62 }
 0x104   : > { %v523_v8 = vshll.u32 %v685_v60, 16 }
 0x105   : > { %v517_v6 = vor.u32 %v515_v1, %v514_v0  ;;  %v522_v7 = vrot.slane %v520_v2, 7  ;;  %v542_v9 = vadd.f32 %v541_v3, %v540_v61  ;;  %v518_v10 = vrot.slane %v514_v0, 4 }
 0x106   : > { %v550_v12 = vrot.slane %v549_v5, 4 }
 0x107   : > { %v534_v13 = vsel %vm532_vm10, %v517_v6, %v533_v4  ;;  %v525_v14 = vor.u32 %v523_v8, %v522_v7  ;;  %v527_v15 = vrot.slane %v522_v7, 4  ;;  %v543_v16 = vrot.slane %v542_v9, 2 }
 0x108   : > { %535 = vst [vmem:[%s911_s18] sm:$0xf] %v534_v13  ;;  %v551_v17 = vadd.f32 %v550_v12, %v549_v5 }
 0x109   : > { %v526_v18 = vsel %vm510_vm11, %v518_v10, %v525_v14  ;;  %v538_v19 = vsel %vm915_vm5, %v527_v15, %v537_v11  ;;  %v544_v20 = vadd.f32 %v543_v16, %v542_v9 }
 0x10a   : > { %536 = vst [vmem:[%s911_s18 + $0x4] sm:$0xf] %v526_v18  ;;  %539 = vst [vmem:[%s911_s18 + $0x8] sm:$0x1] %v538_v19  ;;  %v552_v21 = vrot.slane %v551_v17, 2 }
 0x10b   : > { %v545_v22 = vrot.slane %v544_v20, 1 }
 0x10c   : > { %v553_v23 = vadd.f32 %v552_v21, %v551_v17 }
 0x10d   : > { %v546_v25 = vadd.f32 %v545_v22, %v544_v20 }
 0x10e   : > { %v554_v24 = vrot.slane %v553_v23, 1 }
 0x110   : > { %v555_v26 = vadd.f32 %v554_v24, %v553_v23 }
 0x112   : > { %v557_v27 = vsel %vm492_vm3, %v546_v25, %v555_v26 }
 0x113   : > { %558 = vst [vmem:[%s181_s22] sm:$0x3] %v557_v27 }
 0x114 PF: > { %s14_s12 = sadd.s32 1, %s781_s12  }
 0x115   : > { %p11_p4 = scmp.ge.s32.totalorder %s14_s12, 4  }
 0x117   :  { %13 = sbr.rel (!%p11_p4) target bundleno = 1 (0x1), region = 70 }

// kernel: tile.23
= control target key start
LH: loop header
LB: loop body
LE: loop exit
PB: predicated region body
PF: predicated region fallthrough
CT: control target
= control target key end

     0   :  { %s28_s0 = inlined_call_operand.vmem [shape: f32[8], index: 0, kind: input, shape index: {}]   ;;  %s29_s1 = inlined_call_operand.vmem [shape: f32[16,8], index: 1, kind: output, shape index: {}]  }
   0x1   :  { %v4_v0 = vld [vmem:[%s28_s0] ss:$0 sm:$0xff] }
   0x2   :  { %5 = vst [vmem:[%s29_s1] sm:$0xff] %v4_v0  ;;  %8 = vst [vmem:[%s29_s1 + $0x8] sm:$0xff] %v4_v0 }

// kernel: tile.24
= control target key start
LH: loop header
LB: loop body
LE: loop exit
PB: predicated region body
PF: predicated region fallthrough
CT: control target
= control target key end

     0   :  { %s131_s10 = smov 120   ;;  %s132_s11 = smov 104   ;;  %vm3_vm0 = vcmask 64512   ;;  %vm9_vm1 = vcmask 1048512   ;;  %vm15_vm2 = vcmask 982912   ;;  %vm21_vm3 = vcmask 917312   ;;  %s207_s0 = inlined_call_operand.vmem [shape: f32[16,8], index: 0, kind: input, shape index: {}]   ;;  %s208_s1 = inlined_call_operand.vmem [shape: f32[1,128], index: 1, kind: output, shape index: {}]  }
   0x1   :  { %v101_v0 = vld [vmem:[%s207_s0 + $0xf] sm:$0x1]   ;;  %v103_v1 = vld [vmem:[%s207_s0 + $0xd] sm:$0x1]   ;;  %v102_v2 = vld [vmem:[%s207_s0 + $0xe] sm:$0x1]  }
   0x2   :  { %7 = vrot.lane.b32.xlu0 %v101_v0, %s131_s10  ;;  %19 = vrot.lane.b32.xlu1 %v103_v1, %s132_s11  ;;  %v104_v3 = vld [vmem:[%s207_s0 + $0xc] sm:$0x1]   ;;  %s133_s16 = smov 112   ;;  %s134_s17 = smov 96   ;;  %v105_v4 = vld [vmem:[%s207_s0 + $0xb] sm:$0x1]  }
   0x3   :  { %v106_v5 = vld [vmem:[%s207_s0 + $0xa] sm:$0x1]   ;;  %v2_v6 = vld [vmem:[%s207_s0] sm:$0x1]   ;;  %s135_s24 = smov 88   ;;  %s136_s25 = smov 80  }
   0x4   :  { %4 = vst.msk [vmem:[#allocation0] sm:$0x1] %vm3_vm0, %v2_v6   ;;  %v107_v7 = vld [vmem:[%s207_s0 + $0x9] sm:$0x1]   ;;  %v108_v8 = vld [vmem:[%s207_s0 + $0x8] sm:$0x1]  }
   0x5   :  { %s137_s30 = smov 72   ;;  %s138_s2 = smov 64   ;;  %v109_v9 = vld [vmem:[%s207_s0 + $0x7] sm:$0x1]   ;;  %v110_v10 = vld [vmem:[%s207_s0 + $0x6] sm:$0x1]  }
   0x6   :  { %13 = vrot.lane.b32.xlu0 %v102_v2, %s133_s16  ;;  %25 = vrot.lane.b32.xlu1 %v104_v3, %s134_s17  ;;  %s139_s7 = smov 56   ;;  %s140_s8 = smov 48   ;;  %v111_v11 = vld [vmem:[%s207_s0 + $0x5] sm:$0x1]   ;;  %v112_v12 = vld [vmem:[%s207_s0 + $0x4] sm:$0x1]  }
   0x7   :  { %s141_s13 = smov 40   ;;  %s142_s14 = smov 32   ;;  %v113_v13 = vld [vmem:[%s207_s0 + $0x3] sm:$0x1]   ;;  %v114_v14 = vld [vmem:[%s207_s0 + $0x2] sm:$0x1]  }
   0x8   :  { %s143_s19 = smov 24   ;;  %s144_s20 = smov 16   ;;  %v115_v15 = vld [vmem:[%s207_s0 + $0x1] sm:$0x1]   ;;  %vm27_vm4 = vcmask 851712   ;;  %vm33_vm5 = vcmask 786112  }
   0x9   :  { %s145_s0 = smov 8   ;;  %vm39_vm6 = vcmask 720512   ;;  %vm45_vm7 = vcmask 654912   ;;  %vm51_vm8 = vcmask 589312   ;;  %vm57_vm9 = vcmask 523712  }
   0xa   :  { %31 = vrot.lane.b32.xlu0 %v105_v4, %s135_s24  ;;  %37 = vrot.lane.b32.xlu1 %v106_v5, %s136_s25  ;;  %vm63_vm10 = vcmask 458112   ;;  %vm69_vm11 = vcmask 392512   ;;  %vm75_vm12 = vcmask 326912   ;;  %vm81_vm13 = vcmask 261312  }
   0xb   :  { %vm87_vm14 = vcmask 195712   ;;  %vm93_vm15 = vcmask 130112  }
   0xe   :  { %43 = vrot.lane.b32.xlu0 %v107_v7, %s137_s30  ;;  %49 = vrot.lane.b32.xlu1 %v108_v8, %s138_s2 }
  0x12   :  { %55 = vrot.lane.b32.xlu0 %v109_v9, %s139_s7  ;;  %61 = vrot.lane.b32.xlu1 %v110_v10, %s140_s8 }
  0x16   :  { %67 = vrot.lane.b32.xlu0 %v111_v11, %s141_s13  ;;  %73 = vrot.lane.b32.xlu1 %v112_v12, %s142_s14 }
  0x1a   :  { %79 = vrot.lane.b32.xlu0 %v113_v13, %s143_s19  ;;  %85 = vrot.lane.b32.xlu1 %v114_v14, %s144_s20 }
  0x1e   :  { %91 = vrot.lane.b32.xlu0 %v115_v15, %s145_s0 }
  0x74   :  { %v8_v16 = vpop.permute.xlu0 %7   ;;  %v20_v17 = vpop.permute.xlu1 %19  }
  0x75   :  { %10 = vst.msk [vmem:[#allocation0] sm:$0x1] %vm9_vm1, %v8_v16  }
  0x78   :  { %v14_v18 = vpop.permute.xlu0 %13   ;;  %v26_v19 = vpop.permute.xlu1 %25  }
  0x79   :  { %16 = vst.msk [vmem:[#allocation0] sm:$0x1] %vm15_vm2, %v14_v18  }
  0x7a   :  { %22 = vst.msk [vmem:[#allocation0] sm:$0x1] %vm21_vm3, %v20_v17  }
  0x7b   :  { %28 = vst.msk [vmem:[#allocation0] sm:$0x1] %vm27_vm4, %v26_v19  }
  0x7c   :  { %v32_v20 = vpop.permute.xlu0 %31   ;;  %v38_v21 = vpop.permute.xlu1 %37  }
  0x7d   :  { %34 = vst.msk [vmem:[#allocation0] sm:$0x1] %vm33_vm5, %v32_v20  }
  0x7e   :  { %40 = vst.msk [vmem:[#allocation0] sm:$0x1] %vm39_vm6, %v38_v21  }
  0x80   :  { %v44_v22 = vpop.permute.xlu0 %43   ;;  %v50_v23 = vpop.permute.xlu1 %49  }
  0x81   :  { %46 = vst.msk [vmem:[#allocation0] sm:$0x1] %vm45_vm7, %v44_v22  }
  0x82   :  { %52 = vst.msk [vmem:[#allocation0] sm:$0x1] %vm51_vm8, %v50_v23  }
  0x84   :  { %v56_v24 = vpop.permute.xlu0 %55   ;;  %v62_v25 = vpop.permute.xlu1 %61  }
  0x85   :  { %58 = vst.msk [vmem:[#allocation0] sm:$0x1] %vm57_vm9, %v56_v24  }
  0x86   :  { %64 = vst.msk [vmem:[#allocation0] sm:$0x1] %vm63_vm10, %v62_v25  }
  0x88   :  { %v68_v26 = vpop.permute.xlu0 %67   ;;  %v74_v27 = vpop.permute.xlu1 %73  }
  0x89   :  { %70 = vst.msk [vmem:[#allocation0] sm:$0x1] %vm69_vm11, %v68_v26  }
  0x8a   :  { %76 = vst.msk [vmem:[#allocation0] sm:$0x1] %vm75_vm12, %v74_v27  }
  0x8c   :  { %v80_v28 = vpop.permute.xlu0 %79   ;;  %v86_v29 = vpop.permute.xlu1 %85  }
  0x8d   :  { %82 = vst.msk [vmem:[#allocation0] sm:$0x1] %vm81_vm13, %v80_v28  }
  0x8e   :  { %88 = vst.msk [vmem:[#allocation0] sm:$0x1] %vm87_vm14, %v86_v29  }
  0x90   :  { %v92_v30 = vpop.permute.xlu0 %91  }
  0x91   :  { %94 = vst.msk [vmem:[#allocation0] sm:$0x1] %vm93_vm15, %v92_v30  }
  0x98   :  { %v98_v31 = vld [vmem:[#allocation0] sm:$0x1] }
  0x99   :  { %100 = vst [vmem:[%s208_s1] sm:$0x1] %v98_v31 }

// kernel: basic_block_pallas.3
= control target key start
LH: loop header
LB: loop body
LE: loop exit
PB: predicated region body
PF: predicated region fallthrough
CT: control target
= control target key end

     0   :  { %s882_s18 = smov 0   ;;  %s1000_s0 = inlined_call_operand.vmem [shape: bf16[2,18,128], index: 0, kind: input, shape index: {}]   ;;  %s1001_s1 = inlined_call_operand.vmem [shape: f32[1,128], index: 1, kind: input, shape index: {}]   ;;  %s1002_s2 = inlined_call_operand.vmem [shape: f32[1,128], index: 2, kind: input, shape index: {}]   ;;  %s1003_s3 = inlined_call_operand.vmem [shape: bf16[384,128], index: 3, kind: input, shape index: {}]   ;;  %s1004_s4 = inlined_call_operand.vmem [shape: bf16[2,16,128], index: 4, kind: output, shape index: {0}]   ;;  %s1005_s5 = inlined_call_operand.vmem [shape: f32[2,2,128], index: 5, kind: output, shape index: {1}]  }
   0x1 LB: > { %s700_s19 = sadd.s32 4294967295, %s847_s18   ;;  %p704_p0 = scmp.ge.s32.totalorder %s847_s18, 1  ;;  %s847_s18 = sphi %s882_s18, %s16_s18  }
   0x2   : > { %p190_p1 = scmp.lt.s32.totalorder %s847_s18, 3 }
   0x4   : > { %p191_p2 = pnand %p704_p0, %p190_p1 }
   0x5   : > { %v817_v0 = vld [vmem:[%s1003_s3 + $0x40] sm:$0xff] (!%p191_p2)   ;;  %v849_v1 = vmov (!%p191_p2), 0.0   ;;  %v820_v4 = vld [vmem:[%s1003_s3 + $0x48] sm:$0xff] (!%p191_p2)   ;;  %v823_v7 = vld [vmem:[%s1003_s3 + $0x50] sm:$0xff] (!%p191_p2)   ;;  %p222_p3 = scmp.lt.s32.totalorder (!%p191_p2), %s700_s19, 1  ;;  %vm850_vm0 = vmmov (!%p191_p2), 0   ;;  %v266_v18 = vlaneseq (!%p191_p2) }
   0x6   : > { %194 = sbr.rel (%p191_p2) target bundleno = 275 (0x113), region = 36  ;;  %785 = vmatprep.subr.bf16.mxu1 (!%p191_p2), %v849_v1  ;;  %v818_v2 = vld [vmem:[%s1003_s3] sm:$0xff] (!%p191_p2)   ;;  %754 = vmatprep.subr.bf16.mxu0 (!%p191_p2), %v817_v0  ;;  %v821_v5 = vld [vmem:[%s1003_s3 + $0x8] sm:$0xff] (!%p191_p2)   ;;  %v824_v8 = vld [vmem:[%s1003_s3 + $0x10] sm:$0xff] (!%p191_p2)   ;;  %vm306_vm3 = vcmask (!%p191_p2), 1046528   ;;  %vm851_vm5 = vmmov (!%p191_p2), 1  }
   0x7   : > { %v819_v3 = vld [vmem:[%s1003_s3 + $0x80] sm:$0xff] (!%p191_p2)   ;;  %755 = vmatpush3.bf16.msra.mxu0 (!%p191_p2), %v818_v2  ;;  %v822_v6 = vld [vmem:[%s1003_s3 + $0x88] sm:$0xff] (!%p191_p2)   ;;  %v825_v9 = vld [vmem:[%s1003_s3 + $0x90] sm:$0xff] (!%p191_p2)   ;;  %801 = vmatprep.mubr.msk.bf16.mxu1 (!%p191_p2), %vm850_vm0, %v849_v1  ;;  %v267_v23 = vshrl.u32 (!%p191_p2), %v266_v18, 7  ;;  %vm290_vm4 = vsmask.f32 (!%p191_p2), 7424 }
   0x8   : > { %786 = vmatpush3.bf16.msra.mxu1 (!%p191_p2), %v819_v3  ;;  %756 = vmatprep.subr.bf16.mxu0 (!%p191_p2), %v820_v4  ;;  %v826_v10 = vld [vmem:[%s1003_s3 + $0x58] sm:$0xff] (!%p191_p2)   ;;  %v829_v13 = vld [vmem:[%s1003_s3 + $0x60] sm:$0xff] (!%p191_p2)   ;;  %v832_v16 = vld [vmem:[%s1003_s3 + $0x68] sm:$0xff] (!%p191_p2)   ;;  %vm611_vm7 = vcmask (!%p191_p2), 1040384  }
   0x9   : > { %787 = vmatprep.subr.bf16.mxu1 (!%p191_p2), %v849_v1  ;;  %v827_v11 = vld [vmem:[%s1003_s3 + $0x18] sm:$0xff] (!%p191_p2)   ;;  %v830_v14 = vld [vmem:[%s1003_s3 + $0x20] sm:$0xff] (!%p191_p2)   ;;  %v833_v17 = vld [vmem:[%s1003_s3 + $0x28] sm:$0xff] (!%p191_p2)   ;;  %v269_v32 = vadd.s32 (!%p191_p2), 16, %v267_v23  ;;  %vm270_vm1 = vcmp.ge.s32.totalorder (!%p191_p2), %v267_v23, 1 }
   0xa   : > { %v828_v12 = vld [vmem:[%s1003_s3 + $0x98] sm:$0xff] (!%p191_p2)   ;;  %v831_v15 = vld [vmem:[%s1003_s3 + $0xa0] sm:$0xff] (!%p191_p2)   ;;  %v834_v19 = vld [vmem:[%s1003_s3 + $0xa8] sm:$0xff] (!%p191_p2)  }
   0xb   : > { %757 = vmatpush3.bf16.msra.mxu0 (!%p191_p2), %v821_v5  ;;  %v835_v20 = vld [vmem:[%s1003_s3 + $0x70] sm:$0xff] (!%p191_p2)   ;;  %v838_v24 = vld [vmem:[%s1003_s3 + $0x78] sm:$0xff] (!%p191_p2)   ;;  %v709_v27 = vld [vmem:[%s1001_s1] ss:$0 sm:$0xff] (!%p191_p2)  ;;  %vm275_vm2 = vcmp.le.s32.totalorder (!%p191_p2), %v269_v32, 16 }
   0xc   : > { %788 = vmatpush3.bf16.msra.mxu1 (!%p191_p2), %v822_v6  ;;  %758 = vmatprep.subr.bf16.mxu0 (!%p191_p2), %v823_v7  ;;  %v836_v21 = vld [vmem:[%s1003_s3 + $0x30] sm:$0xff] (!%p191_p2)   ;;  %v710_v31 = vld [vmem:[%s1002_s2] ss:$0 sm:$0xff] (!%p191_p2)  ;;  %v839_v33 = vld [vmem:[%s1003_s3 + $0x38] sm:$0xff] (!%p191_p2)  }
   0xd   : > { %789 = vmatprep.subr.bf16.mxu1 %v849_v1  ;;  %s1007_s19 = smov (!%p222_p3, %s700_s19), 1  ;;  %v837_v22 = vld [vmem:[%s1003_s3 + $0xb0] sm:$0xff]   ;;  %v840_v37 = vld [vmem:[%s1003_s3 + $0xb8] sm:$0xff]   ;;  %vm735_vm6 = vmpackc.low %vm851_vm5, %vm270_vm1 }
   0xe   : > { %s805_s29 = smul.u32 12, %s1007_s19  ;;  %s742_s30 = sshll.u32 %s1007_s19, 3 }
   0xf   : > { %759 = vmatpush3.bf16.msra.mxu0 %v824_v8  ;;  %s231_s8 = scalar_lea.vmem %s1004_s4, %s742_s30  ;;  %s708_s9 = sshll.u32 %s1007_s19, 1 }
  0x10   : > { %790 = vmatpush3.bf16.msra.mxu1 %v825_v9  ;;  %760 = vmatprep.subr.bf16.mxu0 %v826_v10  ;;  %s226_s15 = scalar_lea.vmem %s1000_s0, %s805_s29  ;;  %s235_s12 = scalar_lea.vmem %s1005_s5, %s708_s9 }
  0x11   : > { %791 = vmatprep.subr.bf16.mxu1 %v849_v1  ;;  %v746_v25 = vld [vmem:[%s226_s15] sm:$0xff]   ;;  %v239_v26 = vld [vmem:[%s226_s15 + $0x8] sm:$0x1] }
  0x12   : > { %v747_v28 = vunpack.c.l.bf16 %v746_v25  ;;  %v748_v29 = vunpack.c.h.bf16 %v746_v25  ;;  %v242_v30 = vunpack.c.l.bf16 %v239_v26 }
  0x13   : > { %761 = vmatpush3.bf16.msra.mxu0 %v827_v11 }
  0x14   : > { %792 = vmatpush3.bf16.msra.mxu1 %v828_v12  ;;  %762 = vmatprep.subr.bf16.mxu0 %v829_v13  ;;  %v250_v34 = vmul.f32 %v747_v28, %v709_v27  ;;  %v251_v35 = vmul.f32 %v748_v29, %v709_v27  ;;  %v252_v36 = vmul.f32 %v709_v27, %v242_v30 }
  0x15   : > { %793 = vmatprep.subr.bf16.mxu1 %v849_v1 }
  0x16   : > { %v260_v38 = vadd.f32 %v710_v31, %v250_v34  ;;  %v261_v39 = vadd.f32 %v710_v31, %v251_v35  ;;  %v262_v40 = vadd.f32 %v710_v31, %v252_v36 }
  0x17   : > { %763 = vmatpush3.bf16.msra.mxu0 %v830_v14 }
  0x18   : > { %794 = vmatpush3.bf16.msra.mxu1 %v831_v15  ;;  %764 = vmatprep.subr.bf16.mxu0 %v832_v16  ;;  %v263_v41 = vmax.f32 %v260_v38, 0.0  ;;  %v264_v42 = vmax.f32 %v261_v39, 0.0  ;;  %v265_v43 = vmax.f32 %v262_v40, 0.0 }
  0x19   : > { %795 = vmatprep.subr.bf16.mxu1 %v849_v1 }
  0x1a   : > { %v285_v44 = vsel %vm270_vm1, %v263_v41, 0.0  ;;  %v287_v45 = vsel %vm275_vm2, %v265_v43, 0.0  ;;  %v736_v57 = vpack.c.bf16 %v264_v42, %v263_v41 }
  0x1b   : > { %765 = vmatpush3.bf16.msra.mxu0 %v833_v17  ;;  %v288_v46 = vpack.c.bf16 %v264_v42, %v285_v44  ;;  %v289_v47 = vpack.c.bf16 %v287_v45, %v287_v45 }
  0x1c   : > { %796 = vmatpush3.bf16.msra.mxu1 %v834_v19  ;;  %766 = vmatprep.subr.bf16.mxu0 %v835_v20 }
  0x1d   : > { %797 = vmatprep.subr.bf16.mxu1 %v849_v1  ;;  %v292_v48 = vshrl.u32 %v288_v46, 16  ;;  %v294_v49 = vshll.u32 %v288_v46, 16  ;;  %v299_v50 = vshll.u32 %v289_v47, 16  ;;  %v307_v51 = vrot.slane %v288_v46, 1 }
  0x1e   : > { %v308_v52 = vrot.slane %v289_v47, 1 }
  0x1f   : > { %767 = vmatpush3.bf16.msra.mxu0 %v836_v21  ;;  %v296_v53 = vrot.slane %v294_v49, 1  ;;  %v301_v54 = vrot.slane %v299_v50, 1 }
  0x20   : > { %798 = vmatpush3.bf16.msra.mxu1 %v837_v22  ;;  %768 = vmatprep.subr.bf16.mxu0 %v838_v24  ;;  %v309_v55 = vsel %vm306_vm3, %v307_v51, %v308_v52 }
  0x21   : > { %799 = vmatprep.subr.bf16.mxu1 %v849_v1  ;;  %v297_v56 = vor.u32 %v296_v53, %v292_v48 }
  0x23   : > { %769 = vmatpush3.bf16.msra.mxu0 %v839_v33  ;;  %v302_v58 = vsel %vm290_vm4, %v297_v56, %v301_v54 }
  0x24   : > { %800 = vmatpush3.bf16.msra.mxu1 %v840_v37  ;;  %535 = vmatprep.mubr.bf16.mxu0 %v302_v58 }
  0x26   : > { %737 = vmatmul.mubr.msk.bf16.vlgmr.msra.gmra.mrb[0].mxu0 %vm735_vm6, %v736_v57 }
  0x27   : > { %802 = vmatmul.mubr.bf16.vlgmr.msra.gmra.mrb[0].mxu1 %v309_v55 }
  0xf9   : > { %v770_v63 = vpop.f32.mrb[0].mxu0 }
  0xfa   : > { %v578_v59 = vpop.f32.mrb[0].mxu1  ;;  %v771_v0 = vpop.f32.mrb[1].mxu0 }
  0xfb   : > { %v803_v60 = vpop.f32.mrb[1].mxu1  ;;  %v772_v1 = vadd.f32 %v771_v0, %v770_v63  ;;  %v773_v2 = vpop.f32.mrb[2].mxu0 }
  0xfc   : > { %v581_v61 = vpop.f32.mrb[2].mxu1  ;;  %v774_v3 = vpop.f32.mrb[3].mxu0 }
  0xfd   : > { %v804_v62 = vpop.f32.mrb[3].mxu1  ;;  %v579_v4 = vadd.f32 %v772_v1, %v578_v59  ;;  %v775_v5 = vadd.f32 %v774_v3, %v773_v2 }
  0xff   : > { %v582_v6 = vadd.f32 %v775_v5, %v581_v61  ;;  %v602_v7 = vmul.f32 %v579_v4, %v579_v4 }
 0x101   : > { %v752_v8 = vpack.c.bf16 %v582_v6, %v579_v4  ;;  %v595_v9 = vadd.f32 %v582_v6, %v579_v4  ;;  %v603_v10 = vmul.f32 %v582_v6, %v582_v6 }
 0x103   : > { %753 = vst [vmem:[%s231_s8] sm:$0xff] %v752_v8   ;;  %v596_v11 = vrot.slane %v595_v9, 4  ;;  %v604_v12 = vadd.f32 %v603_v10, %v602_v7 }
 0x105   : > { %v597_v13 = vadd.f32 %v596_v11, %v595_v9  ;;  %v605_v14 = vrot.slane %v604_v12, 4 }
 0x107   : > { %v598_v15 = vrot.slane %v597_v13, 2  ;;  %v606_v16 = vadd.f32 %v605_v14, %v604_v12 }
 0x109   : > { %v599_v17 = vadd.f32 %v598_v15, %v597_v13  ;;  %v607_v18 = vrot.slane %v606_v16, 2 }
 0x10b   : > { %v600_v19 = vrot.slane %v599_v17, 1  ;;  %v608_v20 = vadd.f32 %v607_v18, %v606_v16 }
 0x10d   : > { %v609_v21 = vrot.slane %v608_v20, 1  ;;  %v601_v22 = vadd.f32 %v600_v19, %v599_v17 }
 0x10f   : > { %v610_v23 = vadd.f32 %v609_v21, %v608_v20 }
 0x111   : > { %v612_v24 = vsel %vm611_vm7, %v601_v22, %v610_v23 }
 0x112   : > { %613 = vst [vmem:[%s235_s12] sm:$0x3] %v612_v24 }
 0x113 PF: > { %s16_s18 = sadd.s32 1, %s847_s18  }
 0x114   : > { %p13_p4 = scmp.ge.s32.totalorder %s16_s18, 4  }
 0x116   :  { %15 = sbr.rel (!%p13_p4) target bundleno = 1 (0x1), region = 78 }

</bundles_post_ra>
